<compile_context>
chip_gen: v6e
topology: v6e:2x2x1
jax: 0.10.0
libtpu: 0.0.40
codegen_flags: <defaults>
</compile_context>

<pallas_src>
import jax
import jax.numpy as jnp
from jax.experimental import pallas as pl
from jax.experimental.pallas import tpu as pltpu

EPS = 1e-5  # nn.LayerNorm default


def _mlp_kernel(x_ref,
                w1_ref, b1_ref, g1_ref, beta1_ref,
                w2_ref, b2_ref, g2_ref, beta2_ref,
                w3_ref, b3_ref,
                o_ref):
    # x_ref: (TB, 48) -- natural row-major layout straight from HBM.
    def layer_norm(h, g, beta):
        # Fused single-pass statistics over the feature (sublane) axis.
        s1 = jnp.mean(h, axis=0, keepdims=True)          # (1, TB)
        s2 = jnp.mean(h * h, axis=0, keepdims=True)      # (1, TB)
        var = jnp.maximum(s2 - s1 * s1, 0.0)             # clamp cancellation
        return (h - s1) * jax.lax.rsqrt(var + EPS) * g + beta

    # ---- layer1: Linear(48 -> 96) as W1 @ x^T  => (96, TB) ----
    # NT contraction (both operands contract their last/feature dim) keeps the
    # batch on lanes without any HBM-side transpose of x.
    h = jax.lax.dot_general(
        w1_ref[...], x_ref[...],
        dimension_numbers=(((1,), (1,)), ((), ())),
        preferred_element_type=jnp.float32) + b1_ref[...]
    h = jnp.maximum(layer_norm(h, g1_ref[...], beta1_ref[...]), 0.0)

    # ---- layer2: Linear(96 -> 48)  => (48,96) @ (96,TB) -> (48,TB) ----
    h = jnp.dot(w2_ref[...], h, preferred_element_type=jnp.float32) + b2_ref[...]
    h = jnp.maximum(layer_norm(h, g2_ref[...], beta2_ref[...]), 0.0)

    # ---- output_layer: Linear(48 -> 1) as multiply + sublane reduce ----
    logit = jnp.sum(h * w3_ref[...], axis=0, keepdims=True) + b3_ref[...]  # (1,TB)

    # ---- Sigmoid: exp and approximate reciprocal both run on the EUP ----
    prob = pl.reciprocal(1.0 + jnp.exp(-logit), approx=True)
    o_ref[...] = prob.astype(o_ref.dtype)


def _round_up(n, m):
    return ((n + m - 1) // m) * m


def _prep_params(params):
    """Kernel layout: feature dim on sublanes, broadcast dim (lanes) size 1."""
    return (
        params["w1"],                                    # (96, 48)
        params["b1"].reshape(96, 1),
        params["g1"].reshape(96, 1),
        params["beta1"].reshape(96, 1),
        params["w2"],                                    # (48, 96)
        params["b2"].reshape(48, 1),
        params["g2"].reshape(48, 1),
        params["beta2"].reshape(48, 1),
        params["w3"].reshape(48, 1),                     # (1,48) -> (48,1)
        params["b3"].reshape(1, 1),
    )


def _run_tiles(xs, p_args, TB, num_tiles):
    """Run the kernel over `num_tiles` tiles of TB rows of `xs`.

    `xs` may have more than num_tiles*TB rows; the extra rows are simply never
    touched by the grid (used to avoid slicing/padding the big input in HBM).
    """
    F = xs.shape[1]
    rows = num_tiles * TB

    x_spec = pl.BlockSpec((TB, F), lambda i: (i, 0))
    # Full-array blocks + constant index_map -> VMEM-resident across the grid.
    resident = [pl.BlockSpec(a.shape, lambda i: (0, 0)) for a in p_args]

    cost = pl.CostEstimate(
        flops=2 * rows * (48 * 96 + 96 * 48 + 48) + 16 * rows,
        transcendentals=3 * rows,                               # rsqrt x2 + exp
        bytes_accessed=(rows * F + rows
                        + sum(int(a.size) for a in p_args)) * 4,
    )

    return pl.pallas_call(
        _mlp_kernel,
        out_shape=jax.ShapeDtypeStruct((1, rows), jnp.float32),
        grid_spec=pltpu.PrefetchScalarGridSpec(
            num_scalar_prefetch=0,
            grid=(num_tiles,),
            in_specs=[x_spec] + resident,
            out_specs=pl.BlockSpec((1, TB), lambda i: (0, i)),   # lane-dense out
        ),
        compiler_params=pltpu.CompilerParams(
            dimension_semantics=("parallel",),                   # v7x: 2 TCs share batch
        ),
        cost_estimate=cost,
    )(xs, *p_args)


def binary_classifier_forward(x, params, tile_b=2048):
    """x: (B, 48) float32 -> (B, 1) float32 probabilities."""
    B, F = x.shape
    assert F == 48, "BinaryClassifier expects 48 input features"
    x = x.astype(jnp.float32)
    p_args = _prep_params(params)

    # Lane-dense batch tile (multiple of 128). Main call covers only full tiles
    # of the original array (no HBM pad/transpose copies of the big input);
    # the small remainder goes through a tiny single-tile call.
    TB = max(128, (int(tile_b) // 128) * 128)
    B_main = (B // TB) * TB

    pieces = []
    if B_main > 0:
        pieces.append(_run_tiles(x, p_args, TB, B_main // TB))      # (1, B_main)

    rem = B - B_main
    if rem > 0:
        r_pad = _round_up(rem, 8)
        x_tail = x[B_main:]                                         # < TB rows
        if r_pad != rem:
            x_tail = jnp.pad(x_tail, ((0, r_pad - rem), (0, 0)))
        tail = _run_tiles(x_tail, p_args, r_pad, 1)                 # (1, r_pad)
        pieces.append(tail[:, :rem])

    probs = pieces[0] if len(pieces) == 1 else jnp.concatenate(pieces, axis=1)
    return probs[0, :B].reshape(B, 1)


def init_params(key):
    """PyTorch-layout parameters (nn.Linear: weight (out,in), bias (out,))."""
    ks = jax.random.split(key, 6)

    def linear(kw, kb, fan_in, fan_out):
        bound = 1.0 / jnp.sqrt(fan_in)
        w = jax.random.uniform(kw, (fan_out, fan_in), jnp.float32, -bound, bound)
        b = jax.random.uniform(kb, (fan_out,), jnp.float32, -bound, bound)
        return w, b

    w1, b1 = linear(ks[0], ks[1], 48, 96)
    w2, b2 = linear(ks[2], ks[3], 96, 48)
    w3, b3 = linear(ks[4], ks[5], 48, 1)

    return dict(
        w1=w1, b1=b1,
        g1=jnp.ones((96,), jnp.float32), beta1=jnp.zeros((96,), jnp.float32),
        w2=w2, b2=b2,
        g2=jnp.ones((48,), jnp.float32), beta2=jnp.zeros((48,), jnp.float32),
        w3=w3, b3=b3,
    )


def _reference_forward(x, p):
    """Plain-JAX reference matching the PyTorch module exactly."""
    def ln(h, g, b):
        mu = jnp.mean(h, axis=-1, keepdims=True)
        var = jnp.mean((h - mu) ** 2, axis=-1, keepdims=True)
        return (h - mu) / jnp.sqrt(var + EPS) * g + b

    h = jnp.maximum(ln(x @ p["w1"].T + p["b1"], p["g1"], p["beta1"]), 0.0)
    h = jnp.maximum(ln(h @ p["w2"].T + p["b2"], p["g2"], p["beta2"]), 0.0)
    return jax.nn.sigmoid(h @ p["w3"].T + p["b3"])


if __name__ == "__main__":
    key = jax.random.PRNGKey(0)
    kx, kp, kx2, kx3 = jax.random.split(key, 4)
    params = init_params(kp)

    # Small single-tile (tail-only) case.
    B = 8
    x = jax.random.normal(kx, (B, 48), jnp.float32)
    out = jax.block_until_ready(binary_classifier_forward(x, params))
    ref = _reference_forward(x, params)
    assert out.shape == (B, 1)
    assert jnp.allclose(out, ref, atol=2e-3, rtol=2e-3), "mismatch vs reference (B=8)"

    # Main-grid + remainder path (one full 128-tile plus a 72-row tail call).
    B2 = 200
    x2 = jax.random.normal(kx2, (B2, 48), jnp.float32)
    out2 = jax.block_until_ready(binary_classifier_forward(x2, params, tile_b=128))
    ref2 = _reference_forward(x2, params)
    assert out2.shape == (B2, 1)
    assert jnp.allclose(out2, ref2, atol=2e-3, rtol=2e-3), "mismatch vs reference (B=200)"

    # Pure multi-tile grid (2 tiles, no remainder) -> exercises DMA pipelining.
    B3 = 256
    x3 = jax.random.normal(kx3, (B3, 48), jnp.float32)
    out3 = jax.block_until_ready(binary_classifier_forward(x3, params, tile_b=128))
    ref3 = _reference_forward(x3, params)
    assert out3.shape == (B3, 1)
    assert jnp.allclose(out3, ref3, atol=2e-3, rtol=2e-3), "mismatch vs reference (B=256)"

    print("KERNEL_OK")
</pallas_src>

<mosaic_0001>
module attributes {stable_mosaic.version = 11 : i64} {
  func.func @_mlp_kernel(%arg0: i32, %arg1: memref<8x48xf32, #tpu.memory_space<vmem>>, %arg2: memref<96x48xf32, #tpu.memory_space<vmem>>, %arg3: memref<96x1xf32, #tpu.memory_space<vmem>>, %arg4: memref<96x1xf32, #tpu.memory_space<vmem>>, %arg5: memref<96x1xf32, #tpu.memory_space<vmem>>, %arg6: memref<48x96xf32, #tpu.memory_space<vmem>>, %arg7: memref<48x1xf32, #tpu.memory_space<vmem>>, %arg8: memref<48x1xf32, #tpu.memory_space<vmem>>, %arg9: memref<48x1xf32, #tpu.memory_space<vmem>>, %arg10: memref<48x1xf32, #tpu.memory_space<vmem>>, %arg11: memref<1x1xf32, #tpu.memory_space<vmem>>, %arg12: memref<1x8xf32, #tpu.memory_space<vmem>>) attributes {dimension_semantics = [#tpu.dimension_semantics<parallel>], iteration_bounds = array<i64: 1>, scalar_prefetch = 0 : i64, scratch_operands = 0 : i64, tpu.core_type = #tpu.core_type<tc>, window_params = [{transform_indices = @transform_0, window_bounds = array<i64: 8, 48>}, {pipeline_mode = #tpu.pipeline_mode<synchronous>, transform_indices = @transform_1, window_bounds = array<i64: 96, 48>}, {pipeline_mode = #tpu.pipeline_mode<synchronous>, transform_indices = @transform_2, window_bounds = array<i64: 96, 1>}, {pipeline_mode = #tpu.pipeline_mode<synchronous>, transform_indices = @transform_3, window_bounds = array<i64: 96, 1>}, {pipeline_mode = #tpu.pipeline_mode<synchronous>, transform_indices = @transform_4, window_bounds = array<i64: 96, 1>}, {pipeline_mode = #tpu.pipeline_mode<synchronous>, transform_indices = @transform_5, window_bounds = array<i64: 48, 96>}, {pipeline_mode = #tpu.pipeline_mode<synchronous>, transform_indices = @transform_6, window_bounds = array<i64: 48, 1>}, {pipeline_mode = #tpu.pipeline_mode<synchronous>, transform_indices = @transform_7, window_bounds = array<i64: 48, 1>}, {pipeline_mode = #tpu.pipeline_mode<synchronous>, transform_indices = @transform_8, window_bounds = array<i64: 48, 1>}, {pipeline_mode = #tpu.pipeline_mode<synchronous>, transform_indices = @transform_9, window_bounds = array<i64: 48, 1>}, {pipeline_mode = #tpu.pipeline_mode<synchronous>, transform_indices = @transform_10, window_bounds = array<i64: 1, 1>}, {transform_indices = @transform_11, window_bounds = array<i64: 1, 8>}]} {
    %c0 = arith.constant 0 : index
    %c0_0 = arith.constant 0 : index
    %0 = vector.load %arg2[%c0, %c0_0] : memref<96x48xf32, #tpu.memory_space<vmem>>, vector<96x48xf32>
    %c0_1 = arith.constant 0 : index
    %c0_2 = arith.constant 0 : index
    %1 = vector.load %arg1[%c0_1, %c0_2] : memref<8x48xf32, #tpu.memory_space<vmem>>, vector<8x48xf32>
    %cst = arith.constant dense<0.000000e+00> : vector<96x8xf32>
    %2 = tpu.matmul %0, %1, %cst {dimension_numbers = #tpu.dot_dimension_numbers<[1], [1], [0], [0], [0, 0, 1, 0], [], []>} : vector<96x48xf32>, vector<8x48xf32>, vector<96x8xf32> -> vector<96x8xf32>
    %c0_3 = arith.constant 0 : index
    %c0_4 = arith.constant 0 : index
    %3 = vector.load %arg3[%c0_3, %c0_4] : memref<96x1xf32, #tpu.memory_space<vmem>>, vector<96x1xf32>
    %4 = vector.broadcast %3 : vector<96x1xf32> to vector<96x8xf32>
    %5 = arith.addf %2, %4 : vector<96x8xf32>
    %c0_5 = arith.constant 0 : index
    %c0_6 = arith.constant 0 : index
    %6 = vector.load %arg4[%c0_5, %c0_6] : memref<96x1xf32, #tpu.memory_space<vmem>>, vector<96x1xf32>
    %c0_7 = arith.constant 0 : index
    %c0_8 = arith.constant 0 : index
    %7 = vector.load %arg5[%c0_7, %c0_8] : memref<96x1xf32, #tpu.memory_space<vmem>>, vector<96x1xf32>
    %cst_9 = arith.constant dense<0.000000e+00> : vector<8xf32>
    %8 = vector.multi_reduction <add>, %5, %cst_9 [0] : vector<96x8xf32> to vector<8xf32>
    %9 = vector.shape_cast %8 : vector<8xf32> to vector<1x8xf32>
    %cst_10 = arith.constant 9.600000e+01 : f32
    %10 = vector.broadcast %cst_10 : f32 to vector<1x8xf32>
    %11 = arith.divf %9, %10 : vector<1x8xf32>
    %12 = arith.mulf %5, %5 : vector<96x8xf32>
    %cst_11 = arith.constant dense<0.000000e+00> : vector<8xf32>
    %13 = vector.multi_reduction <add>, %12, %cst_11 [0] : vector<96x8xf32> to vector<8xf32>
    %14 = vector.shape_cast %13 : vector<8xf32> to vector<1x8xf32>
    %cst_12 = arith.constant 9.600000e+01 : f32
    %15 = vector.broadcast %cst_12 : f32 to vector<1x8xf32>
    %16 = arith.divf %14, %15 : vector<1x8xf32>
    %17 = arith.mulf %11, %11 : vector<1x8xf32>
    %18 = arith.subf %16, %17 : vector<1x8xf32>
    %cst_13 = arith.constant 0.000000e+00 : f32
    %19 = vector.broadcast %cst_13 : f32 to vector<1x8xf32>
    %20 = arith.maximumf %18, %19 : vector<1x8xf32>
    %21 = vector.broadcast %11 : vector<1x8xf32> to vector<96x8xf32>
    %22 = arith.subf %5, %21 : vector<96x8xf32>
    %cst_14 = arith.constant 9.99999974E-6 : f32
    %23 = vector.broadcast %cst_14 : f32 to vector<1x8xf32>
    %24 = arith.addf %20, %23 : vector<1x8xf32>
    %25 = math.rsqrt %24 : vector<1x8xf32>
    %26 = vector.broadcast %25 : vector<1x8xf32> to vector<96x8xf32>
    %27 = arith.mulf %22, %26 : vector<96x8xf32>
    %28 = vector.broadcast %6 : vector<96x1xf32> to vector<96x8xf32>
    %29 = arith.mulf %27, %28 : vector<96x8xf32>
    %30 = vector.broadcast %7 : vector<96x1xf32> to vector<96x8xf32>
    %31 = arith.addf %29, %30 : vector<96x8xf32>
    %cst_15 = arith.constant 0.000000e+00 : f32
    %32 = vector.broadcast %cst_15 : f32 to vector<96x8xf32>
    %33 = arith.maximumf %31, %32 : vector<96x8xf32>
    %c0_16 = arith.constant 0 : index
    %c0_17 = arith.constant 0 : index
    %34 = vector.load %arg6[%c0_16, %c0_17] : memref<48x96xf32, #tpu.memory_space<vmem>>, vector<48x96xf32>
    %cst_18 = arith.constant dense<0.000000e+00> : vector<48x8xf32>
    %35 = tpu.matmul %34, %33, %cst_18 {dimension_numbers = #tpu.dot_dimension_numbers<[1], [0], [0], [1], [0, 0, 1, 1], [], []>} : vector<48x96xf32>, vector<96x8xf32>, vector<48x8xf32> -> vector<48x8xf32>
    %c0_19 = arith.constant 0 : index
    %c0_20 = arith.constant 0 : index
    %36 = vector.load %arg7[%c0_19, %c0_20] : memref<48x1xf32, #tpu.memory_space<vmem>>, vector<48x1xf32>
    %37 = vector.broadcast %36 : vector<48x1xf32> to vector<48x8xf32>
    %38 = arith.addf %35, %37 : vector<48x8xf32>
    %c0_21 = arith.constant 0 : index
    %c0_22 = arith.constant 0 : index
    %39 = vector.load %arg8[%c0_21, %c0_22] : memref<48x1xf32, #tpu.memory_space<vmem>>, vector<48x1xf32>
    %c0_23 = arith.constant 0 : index
    %c0_24 = arith.constant 0 : index
    %40 = vector.load %arg9[%c0_23, %c0_24] : memref<48x1xf32, #tpu.memory_space<vmem>>, vector<48x1xf32>
    %cst_25 = arith.constant dense<0.000000e+00> : vector<8xf32>
    %41 = vector.multi_reduction <add>, %38, %cst_25 [0] : vector<48x8xf32> to vector<8xf32>
    %42 = vector.shape_cast %41 : vector<8xf32> to vector<1x8xf32>
    %cst_26 = arith.constant 4.800000e+01 : f32
    %43 = vector.broadcast %cst_26 : f32 to vector<1x8xf32>
    %44 = arith.divf %42, %43 : vector<1x8xf32>
    %45 = arith.mulf %38, %38 : vector<48x8xf32>
    %cst_27 = arith.constant dense<0.000000e+00> : vector<8xf32>
    %46 = vector.multi_reduction <add>, %45, %cst_27 [0] : vector<48x8xf32> to vector<8xf32>
    %47 = vector.shape_cast %46 : vector<8xf32> to vector<1x8xf32>
    %cst_28 = arith.constant 4.800000e+01 : f32
    %48 = vector.broadcast %cst_28 : f32 to vector<1x8xf32>
    %49 = arith.divf %47, %48 : vector<1x8xf32>
    %50 = arith.mulf %44, %44 : vector<1x8xf32>
    %51 = arith.subf %49, %50 : vector<1x8xf32>
    %cst_29 = arith.constant 0.000000e+00 : f32
    %52 = vector.broadcast %cst_29 : f32 to vector<1x8xf32>
    %53 = arith.maximumf %51, %52 : vector<1x8xf32>
    %54 = vector.broadcast %44 : vector<1x8xf32> to vector<48x8xf32>
    %55 = arith.subf %38, %54 : vector<48x8xf32>
    %cst_30 = arith.constant 9.99999974E-6 : f32
    %56 = vector.broadcast %cst_30 : f32 to vector<1x8xf32>
    %57 = arith.addf %53, %56 : vector<1x8xf32>
    %58 = math.rsqrt %57 : vector<1x8xf32>
    %59 = vector.broadcast %58 : vector<1x8xf32> to vector<48x8xf32>
    %60 = arith.mulf %55, %59 : vector<48x8xf32>
    %61 = vector.broadcast %39 : vector<48x1xf32> to vector<48x8xf32>
    %62 = arith.mulf %60, %61 : vector<48x8xf32>
    %63 = vector.broadcast %40 : vector<48x1xf32> to vector<48x8xf32>
    %64 = arith.addf %62, %63 : vector<48x8xf32>
    %cst_31 = arith.constant 0.000000e+00 : f32
    %65 = vector.broadcast %cst_31 : f32 to vector<48x8xf32>
    %66 = arith.maximumf %64, %65 : vector<48x8xf32>
    %c0_32 = arith.constant 0 : index
    %c0_33 = arith.constant 0 : index
    %67 = vector.load %arg10[%c0_32, %c0_33] : memref<48x1xf32, #tpu.memory_space<vmem>>, vector<48x1xf32>
    %68 = vector.broadcast %67 : vector<48x1xf32> to vector<48x8xf32>
    %69 = arith.mulf %66, %68 : vector<48x8xf32>
    %cst_34 = arith.constant dense<0.000000e+00> : vector<8xf32>
    %70 = vector.multi_reduction <add>, %69, %cst_34 [0] : vector<48x8xf32> to vector<8xf32>
    %71 = vector.shape_cast %70 : vector<8xf32> to vector<1x8xf32>
    %c0_35 = arith.constant 0 : index
    %c0_36 = arith.constant 0 : index
    %72 = vector.load %arg11[%c0_35, %c0_36] : memref<1x1xf32, #tpu.memory_space<vmem>>, vector<1x1xf32>
    %73 = vector.broadcast %72 : vector<1x1xf32> to vector<1x8xf32>
    %74 = arith.addf %71, %73 : vector<1x8xf32>
    %cst_37 = arith.constant 0.000000e+00 : f32
    %75 = vector.broadcast %cst_37 : f32 to vector<1x8xf32>
    %76 = arith.subf %75, %74 : vector<1x8xf32>
    %77 = math.exp %76 : vector<1x8xf32>
    %cst_38 = arith.constant 1.000000e+00 : f32
    %78 = vector.broadcast %cst_38 : f32 to vector<1x8xf32>
    %79 = arith.addf %78, %77 : vector<1x8xf32>
    %80 = tpu.reciprocal %79 {approx = true} : vector<1x8xf32> -> vector<1x8xf32>
    %c0_39 = arith.constant 0 : index
    %c0_40 = arith.constant 0 : index
    %81 = vector.load %arg12[%c0_39, %c0_40] : memref<1x8xf32, #tpu.memory_space<vmem>>, vector<1x8xf32>
    tpu.vector_store %arg12[%c0_39, %c0_40], %80 {strides = array<i32>} : memref<1x8xf32, #tpu.memory_space<vmem>>, vector<1x8xf32>,
    return
  }
  func.func @transform_0(%arg0: i32) -> (i32, i32) {
    %c0_i32 = arith.constant 0 : i32
    %c0_i32_0 = arith.constant 0 : i32
    return %arg0, %c0_i32 : i32, i32
  }
  func.func @transform_1(%arg0: i32) -> (i32, i32) {
    %c0_i32 = arith.constant 0 : i32
    %c0_i32_0 = arith.constant 0 : i32
    %c0_i32_1 = arith.constant 0 : i32
    return %c0_i32, %c0_i32_0 : i32, i32
  }
  func.func @transform_2(%arg0: i32) -> (i32, i32) {
    %c0_i32 = arith.constant 0 : i32
    %c0_i32_0 = arith.constant 0 : i32
    %c0_i32_1 = arith.constant 0 : i32
    return %c0_i32, %c0_i32_0 : i32, i32
  }
  func.func @transform_3(%arg0: i32) -> (i32, i32) {
    %c0_i32 = arith.constant 0 : i32
    %c0_i32_0 = arith.constant 0 : i32
    %c0_i32_1 = arith.constant 0 : i32
    return %c0_i32, %c0_i32_0 : i32, i32
  }
  func.func @transform_4(%arg0: i32) -> (i32, i32) {
    %c0_i32 = arith.constant 0 : i32
    %c0_i32_0 = arith.constant 0 : i32
    %c0_i32_1 = arith.constant 0 : i32
    return %c0_i32, %c0_i32_0 : i32, i32
  }
  func.func @transform_5(%arg0: i32) -> (i32, i32) {
    %c0_i32 = arith.constant 0 : i32
    %c0_i32_0 = arith.constant 0 : i32
    %c0_i32_1 = arith.constant 0 : i32
    return %c0_i32, %c0_i32_0 : i32, i32
  }
  func.func @transform_6(%arg0: i32) -> (i32, i32) {
    %c0_i32 = arith.constant 0 : i32
    %c0_i32_0 = arith.constant 0 : i32
    %c0_i32_1 = arith.constant 0 : i32
    return %c0_i32, %c0_i32_0 : i32, i32
  }
  func.func @transform_7(%arg0: i32) -> (i32, i32) {
    %c0_i32 = arith.constant 0 : i32
    %c0_i32_0 = arith.constant 0 : i32
    %c0_i32_1 = arith.constant 0 : i32
    return %c0_i32, %c0_i32_0 : i32, i32
  }
  func.func @transform_8(%arg0: i32) -> (i32, i32) {
    %c0_i32 = arith.constant 0 : i32
    %c0_i32_0 = arith.constant 0 : i32
    %c0_i32_1 = arith.constant 0 : i32
    return %c0_i32, %c0_i32_0 : i32, i32
  }
  func.func @transform_9(%arg0: i32) -> (i32, i32) {
    %c0_i32 = arith.constant 0 : i32
    %c0_i32_0 = arith.constant 0 : i32
    %c0_i32_1 = arith.constant 0 : i32
    return %c0_i32, %c0_i32_0 : i32, i32
  }
  func.func @transform_10(%arg0: i32) -> (i32, i32) {
    %c0_i32 = arith.constant 0 : i32
    %c0_i32_0 = arith.constant 0 : i32
    %c0_i32_1 = arith.constant 0 : i32
    return %c0_i32, %c0_i32_0 : i32, i32
  }
  func.func @transform_11(%arg0: i32) -> (i32, i32) {
    %c0_i32 = arith.constant 0 : i32
    %c0_i32_0 = arith.constant 0 : i32
    return %c0_i32, %arg0 : i32, i32
  }
}

</mosaic_0001>

<bundles_post_ra>
// kernel: tpu_custom_call.1
= control target key start
LH: loop header
LB: loop body
LE: loop exit
PB: predicated region body
PF: predicated region fallthrough
CT: control target
= control target key end

     0   :  { %s1634_s0 = inlined_call_operand.vmem [shape: f32[8,48], index: 0, kind: input, shape index: {}]   ;;  %s1635_s1 = inlined_call_operand.vmem [shape: f32[96,48], index: 1, kind: input, shape index: {}]   ;;  %s1636_s2 = inlined_call_operand.vmem [shape: f32[96,1], index: 2, kind: input, shape index: {}]   ;;  %s1637_s3 = inlined_call_operand.vmem [shape: f32[96,1], index: 3, kind: input, shape index: {}]   ;;  %s1638_s4 = inlined_call_operand.vmem [shape: f32[96,1], index: 4, kind: input, shape index: {}]   ;;  %s1639_s5 = inlined_call_operand.vmem [shape: f32[48,96], index: 5, kind: input, shape index: {}]   ;;  %s1640_s6 = inlined_call_operand.vmem [shape: f32[48,1], index: 6, kind: input, shape index: {}]   ;;  %s1641_s7 = inlined_call_operand.vmem [shape: f32[48,1], index: 7, kind: input, shape index: {}]   ;;  %s1642_s8 = inlined_call_operand.vmem [shape: f32[48,1], index: 8, kind: input, shape index: {}]   ;;  %s1643_s9 = inlined_call_operand.vmem [shape: f32[48,1], index: 9, kind: input, shape index: {}]   ;;  %s1644_s10 = inlined_call_operand.<no memory space> [shape: f32[1,1], index: 10, kind: input, shape index: {}]   ;;  %s1645_s11 = inlined_call_operand.hbm [shape: f32[1,8], index: 11, kind: output, shape index: {}]  }
   0x1   :  { %v16_v0 = vstv %s1644_s10 }
   0x2   :  { %17 = vst [vmem:[#allocation2] sm:$0x1] %v16_v0 }
   0x3   :  { %v53_v1 = vld [vmem:[%s1634_s0] sm:$0xff]  ;;  %vm126_vm0 = vcmask 392192   ;;  %v56_v2 = vld [vmem:[%s1636_s2 + $0x10] sm:$0xff]  ;;  %v1132_v4 = vmov 0   ;;  %v42_v6 = vld [vmem:[%s1635_s1 + $0x8] sm:$0xff] }
   0x4   :  { %v54_v3 = vld [vmem:[%s1636_s2] sm:$0xff]  ;;  %1101 = vset.pattern.permute.xlu1 %v1132_v4  ;;  %1100 = vset.pattern.permute.xlu0 %v1132_v4  ;;  %v57_v7 = vld [vmem:[%s1636_s2 + $0x18] sm:$0xff]  ;;  %v55_v8 = vld [vmem:[%s1636_s2 + $0x8] sm:$0xff] }
   0x5   :  { %v41_v5 = vld [vmem:[%s1635_s1] sm:$0xff]  ;;  %1021 = vmatprep.subr.msk.mxu0 %vm126_vm0, %v53_v1  ;;  %78 = vperm.xlu1 %1101, %v56_v2   ;;  %v43_v9 = vld [vmem:[%s1635_s1 + $0x10] sm:$0xff]  ;;  %v44_v10 = vld [vmem:[%s1635_s1 + $0x18] sm:$0xff] }
   0x6   :  { %68 = vperm.xlu0 %1100, %v54_v3   ;;  %1022 = vmatpush3.xpose.msk.msra.mxu0 %vm126_vm0, %v53_v1  ;;  %v59_v11 = vld [vmem:[%s1636_s2 + $0x28] sm:$0xff]  ;;  %v58_v12 = vld [vmem:[%s1636_s2 + $0x20] sm:$0xff]  ;;  %v61_v15 = vld [vmem:[%s1636_s2 + $0x38] sm:$0xff] }
   0x7   :  { %1023 = vmatprep.mubr.msk.f32.mxu0 %vm126_vm0, %v41_v5  ;;  %v45_v13 = vld [vmem:[%s1635_s1 + $0x20] sm:$0xff]  ;;  %v46_v14 = vld [vmem:[%s1635_s1 + $0x28] sm:$0xff]  ;;  %v60_v16 = vld [vmem:[%s1636_s2 + $0x30] sm:$0xff] }
   0x8   :  { %v47_v17 = vld [vmem:[%s1635_s1 + $0x30] sm:$0xff]  ;;  %v48_v18 = vld [vmem:[%s1635_s1 + $0x38] sm:$0xff]  ;;  %v63_v19 = vld [vmem:[%s1636_s2 + $0x48] sm:$0xff] }
   0x9   :  { %1024 = vmatmul.mubr.msk.f32.vlgmr.msra.gmra.mxu0 %vm126_vm0, %v42_v6  ;;  %83 = vperm.xlu1 %1101, %v57_v7   ;;  %v62_v20 = vld [vmem:[%s1636_s2 + $0x40] sm:$0xff]  ;;  %v50_v22 = vld [vmem:[%s1635_s1 + $0x48] sm:$0xff]  ;;  %v65_v23 = vld [vmem:[%s1636_s2 + $0x58] sm:$0xff] }
   0xa   :  { %73 = vperm.xlu0 %1100, %v55_v8   ;;  %1026 = vmatprep.mubr.msk.f32.mxu0 %vm126_vm0, %v43_v9  ;;  %v49_v21 = vld [vmem:[%s1635_s1 + $0x40] sm:$0xff]  ;;  %v64_v24 = vld [vmem:[%s1636_s2 + $0x50] sm:$0xff]  ;;  %v52_v26 = vld [vmem:[%s1635_s1 + $0x58] sm:$0xff] }
   0xb   :  { %v51_v25 = vld [vmem:[%s1635_s1 + $0x50] sm:$0xff]  ;;  %v302_v28 = vld [vmem:[%s1637_s3 + $0x58] sm:$0xff] }
   0xc   :  { %v301_v27 = vld [vmem:[%s1637_s3 + $0x50] sm:$0xff] }
   0xd   :  { %1027 = vmatmul.mubr.msk.f32.gmra.mxu0 %vm126_vm0, %v44_v10  ;;  %93 = vperm.xlu1 %1101, %v59_v11  }
   0xe   :  { %88 = vperm.xlu0 %1100, %v58_v12   ;;  %1029 = vmatprep.mubr.msk.f32.mxu0 %vm126_vm0, %v45_v13 }
  0x11   :  { %1030 = vmatmul.mubr.msk.f32.gmra.mxu0 %vm126_vm0, %v46_v14  ;;  %103 = vperm.xlu1 %1101, %v61_v15  }
  0x12   :  { %98 = vperm.xlu0 %1100, %v60_v16   ;;  %1032 = vmatprep.mubr.msk.f32.mxu0 %vm126_vm0, %v47_v17 }
  0x15   :  { %1033 = vmatmul.mubr.msk.f32.gmra.mxu0 %vm126_vm0, %v48_v18  ;;  %113 = vperm.xlu1 %1101, %v63_v19  }
  0x16   :  { %108 = vperm.xlu0 %1100, %v62_v20   ;;  %1035 = vmatprep.mubr.msk.f32.mxu0 %vm126_vm0, %v49_v21 }
  0x19   :  { %1036 = vmatmul.mubr.msk.f32.gmra.mxu0 %vm126_vm0, %v50_v22  ;;  %123 = vperm.xlu1 %1101, %v65_v23  }
  0x1a   :  { %118 = vperm.xlu0 %1100, %v64_v24   ;;  %1038 = vmatprep.mubr.msk.f32.mxu0 %vm126_vm0, %v51_v25 }
  0x1b   :  { %18 = vsyncpa [#allocation4], 0  ;;  %v300_v29 = vld [vmem:[%s1637_s3 + $0x48] sm:$0xff]  ;;  %v314_v30 = vld [vmem:[%s1638_s4 + $0x58] sm:$0xff]  ;;  %vm616_vm1 = vcmask 785408   ;;  %vm315_vm2 = vcmask 64512  }
  0x1c   :  { %v299_v31 = vld [vmem:[%s1637_s3 + $0x40] sm:$0xff]  ;;  %v313_v32 = vld [vmem:[%s1638_s4 + $0x50] sm:$0xff]  ;;  %v298_v33 = vld [vmem:[%s1637_s3 + $0x38] sm:$0xff]  ;;  %vm955_vm3 = vcmask 57344  }
  0x1d   :  { %1039 = vmatmul.mubr.msk.f32.gmra.mxu0 %vm126_vm0, %v52_v26  ;;  %470 = vperm.xlu1 %1101, %v301_v27   ;;  %v312_v34 = vld [vmem:[%s1638_s4 + $0x48] sm:$0xff]  ;;  %v297_v35 = vld [vmem:[%s1637_s3 + $0x30] sm:$0xff]  ;;  %v311_v36 = vld [vmem:[%s1638_s4 + $0x40] sm:$0xff] }
  0x1e   :  { %475 = vperm.xlu0 %1100, %v302_v28   ;;  %v296_v37 = vld [vmem:[%s1637_s3 + $0x28] sm:$0xff]  ;;  %v310_v38 = vld [vmem:[%s1638_s4 + $0x38] sm:$0xff]  ;;  %v295_v39 = vld [vmem:[%s1637_s3 + $0x20] sm:$0xff] }
  0x1f   :  { %v309_v40 = vld [vmem:[%s1638_s4 + $0x30] sm:$0xff]  ;;  %v294_v41 = vld [vmem:[%s1637_s3 + $0x18] sm:$0xff]  ;;  %v308_v42 = vld [vmem:[%s1638_s4 + $0x28] sm:$0xff] }
  0x20   :  { %v293_v43 = vld [vmem:[%s1637_s3 + $0x10] sm:$0xff]  ;;  %v307_v44 = vld [vmem:[%s1638_s4 + $0x20] sm:$0xff]  ;;  %v292_v45 = vld [vmem:[%s1637_s3 + $0x8] sm:$0xff] }
  0x21   :  { %465 = vperm.xlu1 %1101, %v300_v29   ;;  %v306_v46 = vld [vmem:[%s1638_s4 + $0x18] sm:$0xff]  ;;  %v291_v47 = vld [vmem:[%s1637_s3] sm:$0xff]  ;;  %v305_v48 = vld [vmem:[%s1638_s4 + $0x10] sm:$0xff] }
  0x22   :  { %547 = vperm.xlu0 %1100, %v314_v30   ;;  %v303_v49 = vld [vmem:[%s1638_s4] sm:$0xff]  ;;  %v304_v50 = vld [vmem:[%s1638_s4 + $0x8] sm:$0xff]  ;;  %v583_v53 = vld [vmem:[%s1640_s6 + $0x18] sm:$0xff] }
  0x23   :  { %v581_v51 = vld [vmem:[%s1640_s6 + $0x8] sm:$0xff]  ;;  %v580_v52 = vld [vmem:[%s1640_s6] sm:$0xff]  ;;  %v582_v54 = vld [vmem:[%s1640_s6 + $0x10] sm:$0xff] }
  0x24   :  { %v585_v55 = vld [vmem:[%s1640_s6 + $0x28] sm:$0xff]  ;;  %v584_v56 = vld [vmem:[%s1640_s6 + $0x20] sm:$0xff]  ;;  %v732_v60 = vld [vmem:[%s1641_s7 + $0x10] sm:$0xff] }
  0x25   :  { %460 = vperm.xlu1 %1101, %v299_v31   ;;  %v731_v57 = vld [vmem:[%s1641_s7 + $0x8] sm:$0xff]  ;;  %v730_v58 = vld [vmem:[%s1641_s7] sm:$0xff]  ;;  %v733_v61 = vld [vmem:[%s1641_s7 + $0x18] sm:$0xff] }
  0x26   :  { %542 = vperm.xlu0 %1100, %v313_v32   ;;  %v736_v59 = vld [vmem:[%s1642_s8] sm:$0xff]  ;;  %v737_v62 = vld [vmem:[%s1642_s8 + $0x8] sm:$0xff]  ;;  %v738_v0 = vld [vmem:[%s1642_s8 + $0x10] sm:$0xff] }
  0x27   :  { %v734_v63 = vld [vmem:[%s1641_s7 + $0x20] sm:$0xff]  ;;  %v739_v2 = vld [vmem:[%s1642_s8 + $0x18] sm:$0xff]  ;;  %v735_v3 = vld [vmem:[%s1641_s7 + $0x28] sm:$0xff] }
  0x28   :  { %v880_v1 = vld [vmem:[%s1643_s9] sm:$0xff]  ;;  %v881_v4 = vld [vmem:[%s1643_s9 + $0x8] sm:$0xff]  ;;  %v882_v5 = vld [vmem:[%s1643_s9 + $0x10] sm:$0xff] }
  0x29   :  { %455 = vperm.xlu1 %1101, %v298_v33   ;;  %v740_v6 = vld [vmem:[%s1642_s8 + $0x20] sm:$0xff]  ;;  %v883_v7 = vld [vmem:[%s1643_s9 + $0x18] sm:$0xff]  ;;  %v741_v8 = vld [vmem:[%s1642_s8 + $0x28] sm:$0xff] }
  0x2a   :  { %537 = vperm.xlu0 %1100, %v312_v34   ;;  %v885_v9 = vld [vmem:[%s1643_s9 + $0x28] sm:$0xff]  ;;  %v884_v10 = vld [vmem:[%s1643_s9 + $0x20] sm:$0xff]  ;;  %v576_v13 = vld [vmem:[%s1639_s5 + $0x10] sm:$0xff] }
  0x2b   :  { %v939_v11 = vld [vmem:[#allocation2] sm:$0x1]  ;;  %1068 = vmatprep.mubr.msk.f32.mxu1 %vm616_vm1, %v576_v13 }
  0x2c   :  { %v574_v12 = vld [vmem:[%s1639_s5] sm:$0xff] }
  0x2d   :  { %450 = vperm.xlu1 %1101, %v297_v35   ;;  %1065 = vmatprep.mubr.msk.f32.mxu0 %vm616_vm1, %v574_v12 }
  0x2e   :  { %532 = vperm.xlu0 %1100, %v311_v36  }
  0x31   :  { %445 = vperm.xlu1 %1101, %v296_v37  }
  0x32   :  { %527 = vperm.xlu0 %1100, %v310_v38  }
  0x35   :  { %440 = vperm.xlu1 %1101, %v295_v39  }
  0x36   :  { %522 = vperm.xlu0 %1100, %v309_v40  }
  0x39   :  { %435 = vperm.xlu1 %1101, %v294_v41  }
  0x3a   :  { %517 = vperm.xlu0 %1100, %v308_v42  }
  0x3d   :  { %430 = vperm.xlu1 %1101, %v293_v43  }
  0x3e   :  { %512 = vperm.xlu0 %1100, %v307_v44  }
  0x41   :  { %425 = vperm.xlu1 %1101, %v292_v45  }
  0x42   :  { %507 = vperm.xlu0 %1100, %v306_v46  }
  0x45   :  { %420 = vperm.xlu1 %1101, %v291_v47  }
  0x46   :  { %502 = vperm.xlu0 %1100, %v305_v48  }
  0x49   :  { %492 = vperm.xlu1 %1101, %v303_v49  }
  0x4a   :  { %497 = vperm.xlu0 %1100, %v304_v50  }
  0x4d   :  { %593 = vperm.xlu1 %1101, %v581_v51  }
  0x4e   :  { %588 = vperm.xlu0 %1100, %v580_v52  }
  0x51   :  { %603 = vperm.xlu1 %1101, %v583_v53  }
  0x52   :  { %598 = vperm.xlu0 %1100, %v582_v54  }
  0x55   :  { %613 = vperm.xlu1 %1101, %v585_v55  }
  0x56   :  { %608 = vperm.xlu0 %1100, %v584_v56  }
  0x59   :  { %809 = vperm.xlu1 %1101, %v731_v57  }
  0x5a   :  { %804 = vperm.xlu0 %1100, %v730_v58  }
  0x5d   :  { %840 = vperm.xlu1 %1101, %v736_v59  }
  0x5e   :  { %814 = vperm.xlu0 %1100, %v732_v60  }
  0x61   :  { %819 = vperm.xlu1 %1101, %v733_v61  }
  0x62   :  { %845 = vperm.xlu0 %1100, %v737_v62  }
  0x65   :  { %824 = vperm.xlu1 %1101, %v734_v63  }
  0x66   :  { %850 = vperm.xlu0 %1100, %v738_v0  }
  0x69   :  { %888 = vperm.xlu1 %1101, %v880_v1  }
  0x6a   :  { %855 = vperm.xlu0 %1100, %v739_v2  }
  0x6d   :  { %829 = vperm.xlu1 %1101, %v735_v3  }
  0x6e   :  { %893 = vperm.xlu0 %1100, %v881_v4  }
  0x71   :  { %898 = vperm.xlu1 %1101, %v882_v5  }
  0x72   :  { %860 = vperm.xlu0 %1100, %v740_v6  }
  0x75   :  { %903 = vperm.xlu1 %1101, %v883_v7  }
  0x76   :  { %865 = vperm.xlu0 %1100, %v741_v8  }
  0x79   :  { %913 = vperm.xlu1 %1101, %v885_v9  }
  0x7a   :  { %908 = vperm.xlu0 %1100, %v884_v10  }
  0x7e   :  { %942 = vperm.xlu0 %1100, %v939_v11  }
  0x80   :  { %v79_v15 = vpop.permute.xlu1 %78 }
  0x81   :  { %v69_v14 = vpop.permute.xlu0 %68 }
  0x84   :  { %v84_v17 = vpop.permute.xlu1 %83 }
  0x85   :  { %v74_v16 = vpop.permute.xlu0 %73 }
  0x88   :  { %v94_v19 = vpop.permute.xlu1 %93 }
  0x89   :  { %v89_v18 = vpop.permute.xlu0 %88 }
  0x8c   :  { %v104_v26 = vpop.permute.xlu1 %103 }
  0x8d   :  { %v99_v23 = vpop.permute.xlu0 %98 }
  0x90   :  { %v114_v46 = vpop.permute.xlu1 %113 }
  0x91   :  { %v109_v38 = vpop.permute.xlu0 %108 }
  0x94   :  { %v124_v5 = vpop.permute.xlu1 %123 }
  0x95   :  { %v119_v61 = vpop.permute.xlu0 %118 }
  0xc9   :  { %v1025_v20 = vpop.f32.mrf.mxu0 }
  0xca   :  { %v1438_v21 = vadd.f32 %v1025_v20, %v74_v16  ;;  %v1498_v20 = vpop.permute.xlu0 %475 }
  0xcb   :  { %v232_v22 = vpop.f32.mrf.mxu0 }
  0xcc   :  { %v1440_v24 = vadd.f32 %v232_v22, %v69_v14  ;;  %v348_v27 = vmul.f32 %v1438_v21, %v1438_v21  ;;  %v317_v32 = vsel %vm315_vm2, %v1438_v21, 0.0 }
  0xcd   :  { %v1028_v25 = vpop.f32.mrf.mxu0 }
  0xce   :  { %v316_v28 = vsel %vm315_vm2, %v1440_v24, 0.0  ;;  %v347_v29 = vmul.f32 %v1440_v24, %v1440_v24  ;;  %v1448_v30 = vadd.f32 %v1028_v25, %v84_v17  ;;  %v360_v39 = vsel %vm315_vm2, %v348_v27, 0.0 }
  0xcf   :  { %v242_v31 = vpop.f32.mrf.mxu0  ;;  %v318_v35 = vadd.f32 %v317_v32, %v316_v28 }
  0xd0   :  { %v359_v33 = vsel %vm315_vm2, %v347_v29, 0.0  ;;  %v1453_v34 = vadd.f32 %v242_v31, %v79_v15  ;;  %v350_v36 = vmul.f32 %v1448_v30, %v1448_v30  ;;  %v321_v47 = vsel %vm315_vm2, %v1448_v30, 0.0  ;;  %v471_v31 = vpop.permute.xlu1 %470 }
  0xd1   :  { %v1031_v37 = vpop.f32.mrf.mxu0  ;;  %v361_v43 = vadd.f32 %v360_v39, %v359_v33 }
  0xd2   :  { %v319_v40 = vsel %vm315_vm2, %v1453_v34, 0.0  ;;  %v349_v41 = vmul.f32 %v1453_v34, %v1453_v34  ;;  %v1462_v42 = vadd.f32 %v1031_v37, %v94_v19  ;;  %v364_v50 = vsel %vm315_vm2, %v350_v36, 0.0 }
  0xd3   :  { %v320_v44 = vadd.f32 %v319_v40, %v318_v35  ;;  %v252_v45 = vpop.f32.mrf.mxu0 }
  0xd4   :  { %v362_v48 = vsel %vm315_vm2, %v349_v41, 0.0  ;;  %v1467_v49 = vadd.f32 %v252_v45, %v89_v18  ;;  %v352_v54 = vmul.f32 %v1462_v42, %v1462_v42  ;;  %v325_v62 = vsel %vm315_vm2, %v1462_v42, 0.0  ;;  %v548_v45 = vpop.permute.xlu0 %547 }
  0xd5   :  { %v363_v51 = vadd.f32 %v362_v48, %v361_v43  ;;  %v322_v52 = vadd.f32 %v321_v47, %v320_v44  ;;  %v1034_v53 = vpop.f32.mrf.mxu0 }
  0xd6   :  { %v323_v55 = vsel %vm315_vm2, %v1467_v49, 0.0  ;;  %v351_v56 = vmul.f32 %v1467_v49, %v1467_v49  ;;  %v1476_v57 = vadd.f32 %v1034_v53, %v104_v26  ;;  %v368_v6 = vsel %vm315_vm2, %v352_v54, 0.0 }
  0xd7   :  { %v324_v58 = vadd.f32 %v323_v55, %v322_v52  ;;  %v365_v59 = vadd.f32 %v364_v50, %v363_v51  ;;  %v262_v60 = vpop.f32.mrf.mxu0  ;;  %v466_v51 = vpop.permute.xlu1 %465 }
  0xd8   :  { %v366_v63 = vsel %vm315_vm2, %v351_v56, 0.0  ;;  %v1481_v0 = vadd.f32 %v262_v60, %v99_v23  ;;  %v354_v2 = vmul.f32 %v1476_v57, %v1476_v57  ;;  %v329_v13 = vsel %vm315_vm2, %v1476_v57, 0.0 }
  0xd9   :  { %v367_v1 = vadd.f32 %v366_v63, %v365_v59  ;;  %v326_v3 = vadd.f32 %v325_v62, %v324_v58  ;;  %v1037_v4 = vpop.f32.mrf.mxu0  ;;  %v543_v58 = vpop.permute.xlu0 %542 }
  0xda   :  { %v327_v7 = vsel %vm315_vm2, %v1481_v0, 0.0  ;;  %v353_v8 = vmul.f32 %v1481_v0, %v1481_v0  ;;  %v1490_v9 = vadd.f32 %v1037_v4, %v114_v46  ;;  %v372_v16 = vsel %vm315_vm2, %v354_v2, 0.0 }
  0xdb   :  { %v328_v10 = vadd.f32 %v327_v7, %v326_v3  ;;  %v369_v11 = vadd.f32 %v368_v6, %v367_v1  ;;  %v272_v12 = vpop.f32.mrf.mxu0 }
  0xdc   :  { %v370_v14 = vsel %vm315_vm2, %v353_v8, 0.0  ;;  %v1495_v15 = vadd.f32 %v272_v12, %v109_v38  ;;  %v356_v22 = vmul.f32 %v1490_v9, %v1490_v9  ;;  %v333_v32 = vsel %vm315_vm2, %v1490_v9, 0.0 }
  0xdd   :  { %v371_v17 = vadd.f32 %v370_v14, %v369_v11  ;;  %v330_v18 = vadd.f32 %v329_v13, %v328_v10  ;;  %v1040_v19 = vpop.f32.mrf.mxu0  ;;  %v538_v3 = vpop.permute.xlu0 %537 }
  0xde   :  { %v331_v23 = vsel %vm315_vm2, %v1495_v15, 0.0  ;;  %v355_v25 = vmul.f32 %v1495_v15, %v1495_v15  ;;  %v1506_v26 = vadd.f32 %v1040_v19, %v124_v5  ;;  %v376_v38 = vsel %vm315_vm2, %v356_v22, 0.0 }
  0xdf   :  { %v332_v27 = vadd.f32 %v331_v23, %v330_v18  ;;  %v373_v28 = vadd.f32 %v372_v16, %v371_v17  ;;  %v282_v29 = vpop.f32.mrf.mxu0 }
  0xe0   :  { %v374_v33 = vsel %vm315_vm2, %v355_v25, 0.0  ;;  %v283_v35 = vadd.f32 %v282_v29, %v119_v61  ;;  %v358_v39 = vmul.f32 %v1506_v26, %v1506_v26  ;;  %v337_v46 = vsel %vm315_vm2, %v1506_v26, 0.0  ;;  %v461_v61 = vpop.permute.xlu1 %460 }
  0xe1   :  { %v375_v36 = vadd.f32 %v374_v33, %v373_v28  ;;  %v334_v37 = vadd.f32 %v333_v32, %v332_v27  ;;  %v533_v12 = vpop.permute.xlu0 %532 }
  0xe2   :  { %v335_v40 = vsel %vm315_vm2, %v283_v35, 0.0  ;;  %v357_v41 = vmul.f32 %v283_v35, %v283_v35  ;;  %v380_v52 = vsel %vm315_vm2, %v358_v39, 0.0 }
  0xe3   :  { %v336_v43 = vadd.f32 %v335_v40, %v334_v37  ;;  %v377_v44 = vadd.f32 %v376_v38, %v375_v36 }
  0xe4   :  { %v378_v47 = vsel %vm315_vm2, %v357_v41, 0.0  ;;  %v456_v6 = vpop.permute.xlu1 %455 }
  0xe5   :  { %v338_v48 = vadd.f32 %v337_v46, %v336_v43  ;;  %v379_v50 = vadd.f32 %v378_v47, %v377_v44  ;;  %v528_v18 = vpop.permute.xlu0 %527 }
  0xe7   :  { %v339_v53 = vrot.slane %v338_v48, 4  ;;  %v381_v54 = vadd.f32 %v380_v52, %v379_v50 }
  0xe8   :  { %v451_v14 = vpop.permute.xlu1 %450 }
  0xe9   :  { %v340_v55 = vadd.f32 %v339_v53, %v338_v48  ;;  %v382_v56 = vrot.slane %v381_v54, 4  ;;  %v523_v22 = vpop.permute.xlu0 %522 }
  0xeb   :  { %v341_v59 = vrot.slane %v340_v55, 2  ;;  %v383_v60 = vadd.f32 %v382_v56, %v381_v54 }
  0xec   :  { %v446_v19 = vpop.permute.xlu1 %445 }
  0xed   :  { %v342_v62 = vadd.f32 %v341_v59, %v340_v55  ;;  %v384_v63 = vrot.slane %v383_v60, 2  ;;  %v518_v25 = vpop.permute.xlu0 %517 }
  0xef   :  { %v343_v1 = vrot.slane %v342_v62, 1  ;;  %v385_v2 = vadd.f32 %v384_v63, %v383_v60 }
  0xf0   :  { %v441_v23 = vpop.permute.xlu1 %440 }
  0xf1   :  { %v344_v4 = vadd.f32 %v343_v1, %v342_v62  ;;  %v386_v5 = vrot.slane %v385_v2, 1  ;;  %v513_v44 = vpop.permute.xlu0 %512 }
  0xf3   :  { %v1519_v7 = vmul.f32 0.010416667, %v344_v4  ;;  %v387_v8 = vadd.f32 %v386_v5, %v385_v2 }
  0xf4   :  { %v436_v36 = vpop.permute.xlu1 %435 }
  0xf5   :  { %v388_v10 = vmul.f32 0.010416667, %v387_v8  ;;  %v389_v11 = vmul.f32 %v1519_v7, %v1519_v7  ;;  %v402_v27 = vsub.f32 %v283_v35, %v1519_v7  ;;  %v403_v28 = vsub.f32 %v1506_v26, %v1519_v7 }
  0xf6   :  { %v401_v29 = vsub.f32 %v1490_v9, %v1519_v7  ;;  %v400_v32 = vsub.f32 %v1495_v15, %v1519_v7  ;;  %v399_v37 = vsub.f32 %v1476_v57, %v1519_v7  ;;  %v398_v9 = vsub.f32 %v1481_v0, %v1519_v7 }
  0xf7   :  { %v390_v13 = vsub.f32 %v388_v10, %v389_v11  ;;  %v397_v57 = vsub.f32 %v1462_v42, %v1519_v7  ;;  %v396_v53 = vsub.f32 %v1467_v49, %v1519_v7  ;;  %v394_v49 = vsub.f32 %v1453_v34, %v1519_v7 }
  0xf8   :  { %v431_v52 = vpop.permute.xlu1 %430  ;;  %v393_v63 = vsub.f32 %v1438_v21, %v1519_v7  ;;  %v392_v4 = vsub.f32 %v1440_v24, %v1519_v7 }
  0xf9   :  { %v391_v16 = vmax.f32 %v390_v13, 0.0 }
  0xfb   :  { %v404_v17 = vadd.f32 1e-05, %v391_v16 }
  0xfc   :  { %v426_v62 = vpop.permute.xlu1 %425 }
  0xfd   :  { %1102 = vrsqrt.f32 %v404_v17 }
 0x100   :  { %v421_v16 = vpop.permute.xlu1 %420 }
 0x10a   :  { %v1530_v33 = vpop.eup %1102 }
 0x10b   :  { %v416_v38 = vmul.f32 %v1530_v33, %v402_v27  ;;  %v417_v39 = vmul.f32 %v1530_v33, %v403_v28  ;;  %v415_v35 = vmul.f32 %v1530_v33, %v401_v29  ;;  %v414_v26 = vmul.f32 %v1530_v33, %v400_v32  ;;  %v493_v28 = vpop.permute.xlu1 %492 }
 0x10c   :  { %v413_v43 = vmul.f32 %v1530_v33, %v399_v37  ;;  %v412_v50 = vmul.f32 %v1530_v33, %v398_v9  ;;  %v410_v56 = vmul.f32 %v1530_v33, %v396_v53  ;;  %v408_v34 = vmul.f32 %v1530_v33, %v394_v49  ;;  %v575_v37 = vld [vmem:[%s1639_s5 + $0x8] sm:$0xff] }
 0x10d   :  { %v488_v40 = vmul.f32 %v471_v31, %v416_v38  ;;  %v489_v15 = vmul.f32 %v1498_v20, %v417_v39  ;;  %v487_v41 = vmul.f32 %v466_v51, %v415_v35  ;;  %v486_v48 = vmul.f32 %v461_v61, %v414_v26  ;;  %v577_v38 = vld [vmem:[%s1639_s5 + $0x18] sm:$0xff]  ;;  %v578_v39 = vld [vmem:[%s1639_s5 + $0x20] sm:$0xff]  ;;  %v579_v35 = vld [vmem:[%s1639_s5 + $0x28] sm:$0xff]  ;;  %s1133_s5 = smov [#allocation3]  }
 0x10e   :  { %v485_v54 = vmul.f32 %v456_v6, %v413_v43  ;;  %v411_v20 = vmul.f32 %v1530_v33, %v397_v57  ;;  %v395_v51 = vsub.f32 %v1448_v30, %v1519_v7  ;;  %v484_v55 = vmul.f32 %v451_v14, %v412_v50  ;;  %s963_s30 = sshll.u32 %s1133_s5, 4  ;;  %s964_s30 = int_to_ptr.vmem [resolvable:$true] %s963_s30 }
 0x10f   :  { %v561_v46 = vadd.f32 %v548_v45, %v489_v15  ;;  %v560_v47 = vadd.f32 %v543_v58, %v488_v40  ;;  %v559_v31 = vadd.f32 %v538_v3, %v487_v41  ;;  %v558_v45 = vadd.f32 %v533_v12, %v486_v48  ;;  %v508_v58 = vpop.permute.xlu0 %507  ;;  %v594_v9 = vpop.permute.xlu1 %593  ;;  %s1110_s12 = scalar_lea.vmem %s964_s30, 16  ;;  %s1114_s1 = scalar_lea.vmem %s964_s30, 32 }
 0x110   :  { %v557_v60 = vadd.f32 %v528_v18, %v485_v54  ;;  %v483_v61 = vmul.f32 %v446_v19, %v411_v20  ;;  %v409_v30 = vmul.f32 %v1530_v33, %v395_v51  ;;  %v556_v2 = vadd.f32 %v523_v22, %v484_v55  ;;  %p1111_p0 = scmp.ne.s32.totalorder %s964_s30, %s1110_s12  ;;  %p1115_p1 = scmp.lt.s32.totalorder %s964_s30, %s964_s30 }
 0x111   :  { %v573_v0 = vmax.f32 %v561_v46, 0.0  ;;  %v572_v42 = vmax.f32 %v560_v47, 0.0  ;;  %v571_v59 = vmax.f32 %v559_v31, 0.0  ;;  %v570_v1 = vmax.f32 %v558_v45, 0.0  ;;  %p1116_p2 = scmp.lt.s32.totalorder %s1114_s1, %s1110_s12 }
 0x112   :  { %v482_v3 = vmul.f32 %v441_v23, %v410_v56  ;;  %v569_v5 = vmax.f32 %v557_v60, 0.0  ;;  %v555_v6 = vadd.f32 %v518_v25, %v483_v61  ;;  %v481_v8 = vmul.f32 %v436_v36, %v409_v30 }
 0x113   :  { %1041 = vmatprep.subr.mxu0 %v573_v0  ;;  %1074 = vmatprep.subr.mxu1 %v573_v0  ;;  %v407_v10 = vmul.f32 %v1530_v33, %v393_v63  ;;  %v503_v21 = vpop.permute.xlu0 %502  ;;  %v568_v11 = vmax.f32 %v556_v2, 0.0  ;;  %v480_v13 = vmul.f32 %v431_v52, %v408_v34  ;;  %v406_v14 = vmul.f32 %v1530_v33, %v392_v4  ;;  %v604_v43 = vpop.permute.xlu1 %603  ;;  %p1117_p3 = por %p1116_p2, %p1115_p1 }
 0x114   :  { %1042 = vmatpush3.msra.mxu0 %v573_v0  ;;  %1086 = vmatpush3.msra.mxu1 %v573_v0  ;;  %v554_v12 = vadd.f32 %v513_v44, %v482_v3  ;;  %v567_v24 = vmax.f32 %v555_v6, 0.0  ;;  %v553_v7 = vadd.f32 %v508_v58, %v481_v8 }
 0x115   :  { %1043 = vmatprep.subr.mxu0 %v572_v42  ;;  %1075 = vmatprep.subr.mxu1 %v572_v42  ;;  %v479_v17 = vmul.f32 %v426_v62, %v407_v10  ;;  %v552_v19 = vadd.f32 %v503_v21, %v480_v13  ;;  %v478_v22 = vmul.f32 %v421_v16, %v406_v14  ;;  %p1118_p4 = pnand %p1117_p3, %p1111_p0 }
 0x116   :  { %1044 = vmatpush3.msra.mxu0 %v572_v42  ;;  %1087 = vmatpush3.msra.mxu1 %v572_v42  ;;  %v566_v18 = vmax.f32 %v554_v12, 0.0  ;;  %v565_v25 = vmax.f32 %v553_v7, 0.0 }
 0x117   :  { %1045 = vmatprep.subr.mxu0 %v571_v59  ;;  %1076 = vmatprep.subr.mxu1 %v571_v59  ;;  %v498_v23 = vpop.permute.xlu0 %497  ;;  %v564_v29 = vmax.f32 %v552_v19, 0.0  ;;  %v550_v32 = vadd.f32 %v493_v28, %v478_v22  ;;  %v614_v45 = vpop.permute.xlu1 %613 }
 0x118   :  { %1046 = vmatpush3.msra.mxu0 %v571_v59  ;;  %1088 = vmatpush3.msra.mxu1 %v571_v59  ;;  %v551_v27 = vadd.f32 %v498_v23, %v479_v17 }
 0x119   :  { %1047 = vmatprep.subr.mxu0 %v570_v1  ;;  %1077 = vmatprep.subr.mxu1 %v570_v1  ;;  %v562_v36 = vmax.f32 %v550_v32, 0.0 }
 0x11a   :  { %1048 = vmatpush3.msra.mxu0 %v570_v1  ;;  %1089 = vmatpush3.msra.mxu1 %v570_v1  ;;  %v563_v33 = vmax.f32 %v551_v27, 0.0 }
 0x11b   :  { %1049 = vmatprep.subr.mxu0 %v569_v5  ;;  %1078 = vmatprep.subr.mxu1 %v569_v5  ;;  %v589_v26 = vpop.permute.xlu0 %588  ;;  %v810_v17 = vpop.permute.xlu1 %809 }
 0x11c   :  { %1050 = vmatpush3.msra.mxu0 %v569_v5  ;;  %1090 = vmatpush3.msra.mxu1 %v569_v5 }
 0x11d   :  { %1051 = vmatprep.subr.mxu0 %v568_v11  ;;  %1079 = vmatprep.subr.mxu1 %v568_v11 }
 0x11e   :  { %1052 = vmatpush3.msra.mxu0 %v568_v11  ;;  %1091 = vmatpush3.msra.mxu1 %v568_v11 }
 0x11f   :  { %1053 = vmatprep.subr.mxu0 %v567_v24  ;;  %1080 = vmatprep.subr.mxu1 %v567_v24  ;;  %v599_v40 = vpop.permute.xlu0 %598 }
 0x120   :  { %1054 = vmatpush3.msra.mxu0 %v567_v24  ;;  %1092 = vmatpush3.msra.mxu1 %v567_v24 }
 0x121   :  { %1055 = vmatprep.subr.mxu0 %v566_v18  ;;  %1081 = vmatprep.subr.mxu1 %v566_v18 }
 0x122   :  { %1056 = vmatpush3.msra.mxu0 %v566_v18  ;;  %1093 = vmatpush3.msra.mxu1 %v566_v18 }
 0x123   :  { %1057 = vmatprep.subr.mxu0 %v565_v25  ;;  %1082 = vmatprep.subr.mxu1 %v565_v25  ;;  %v609_v0 = vpop.permute.xlu0 %608 }
 0x124   :  { %1058 = vmatpush3.msra.mxu0 %v565_v25  ;;  %1094 = vmatpush3.msra.mxu1 %v565_v25 }
 0x125   :  { %1059 = vmatprep.subr.mxu0 %v564_v29  ;;  %1083 = vmatprep.subr.mxu1 %v564_v29 }
 0x126   :  { %1060 = vmatpush3.msra.mxu0 %v564_v29  ;;  %1095 = vmatpush3.msra.mxu1 %v564_v29  ;;  %v841_v29 = vpop.permute.xlu1 %840 }
 0x127   :  { %1061 = vmatprep.subr.mxu0 %v563_v33  ;;  %1084 = vmatprep.subr.mxu1 %v563_v33  ;;  %v805_v12 = vpop.permute.xlu0 %804 }
 0x128   :  { %1062 = vmatpush3.msra.mxu0 %v563_v33  ;;  %1096 = vmatpush3.msra.mxu1 %v563_v33 }
 0x129   :  { %1063 = vmatprep.subr.mxu0 %v562_v36  ;;  %1085 = vmatprep.subr.mxu1 %v562_v36 }
 0x12a   :  { %1064 = vmatpush3.msra.mxu0 %v562_v36  ;;  %1097 = vmatpush3.msra.mxu1 %v562_v36 }
 0x12b   :  { %1066 = vmatmul.mubr.msk.f32.vlgmr.msra.gmra.mxu0 %vm616_vm1, %v575_v37  ;;  %1069 = vmatmul.mubr.msk.f32.vlgmr.msra.gmra.mxu1 %vm616_vm1, %v577_v38  ;;  %v815_v22 = vpop.permute.xlu0 %814 }
 0x12c   :  { %1071 = vmatprep.mubr.msk.f32.mxu1 %vm616_vm1, %v578_v39 }
 0x12f   :  { %1072 = vmatmul.mubr.msk.f32.gmra.mxu1 %vm616_vm1, %v579_v35  ;;  %v846_v36 = vpop.permute.xlu0 %845 }
 0x1eb   :  { %v1067_v15 = vpop.f32.mrf.mxu0  ;;  %v1070_v41 = vpop.f32.mrf.mxu1 }
 0x1ec   :  { %v1577_v44 = vadd.f32 %v1067_v15, %v594_v9  ;;  %v1579_v47 = vadd.f32 %v1070_v41, %v604_v43  ;;  %v851_v15 = vpop.permute.xlu0 %850 }
 0x1ed   :  { %v701_v57 = vpop.f32.mrf.mxu0  ;;  %v711_v46 = vpop.f32.mrf.mxu1 }
 0x1ee   :  { %v762_v48 = vmul.f32 %v1577_v44, %v1577_v44  ;;  %v1583_v50 = vadd.f32 %v701_v57, %v589_v26  ;;  %v1585_v52 = vadd.f32 %v711_v46, %v599_v40  ;;  %v743_v31 = vsel %vm315_vm2, %v1577_v44, 0.0  ;;  %v820_v26 = vpop.permute.xlu1 %819 }
 0x1ef   :  { %v1073_v53 = vpop.f32.mrf.mxu1  ;;  %v764_v55 = vmul.f32 %v1579_v47, %v1579_v47  ;;  %v747_v63 = vsel %vm315_vm2, %v1579_v47, 0.0 }
 0x1f0   :  { %v742_v54 = vsel %vm315_vm2, %v1583_v50, 0.0  ;;  %v761_v20 = vmul.f32 %v1583_v50, %v1583_v50  ;;  %v763_v51 = vmul.f32 %v1585_v52, %v1585_v52  ;;  %v768_v49 = vsel %vm315_vm2, %v762_v48, 0.0  ;;  %v856_v48 = vpop.permute.xlu0 %855 }
 0x1f1   :  { %v721_v42 = vpop.f32.mrf.mxu1  ;;  %v744_v56 = vadd.f32 %v743_v31, %v742_v54  ;;  %v745_v60 = vsel %vm315_vm2, %v1585_v52, 0.0  ;;  %v1603_v61 = vadd.f32 %v1073_v53, %v614_v45  ;;  %v772_v4 = vsel %vm315_vm2, %v764_v55, 0.0 }
 0x1f2   :  { %v1597_v58 = vadd.f32 %v721_v42, %v609_v0  ;;  %v767_v59 = vsel %vm315_vm2, %v761_v20, 0.0  ;;  %v770_v1 = vsel %vm315_vm2, %v763_v51, 0.0  ;;  %v825_v57 = vpop.permute.xlu1 %824 }
 0x1f3   :  { %v769_v30 = vadd.f32 %v768_v49, %v767_v59  ;;  %v746_v62 = vadd.f32 %v745_v60, %v744_v56  ;;  %v766_v5 = vmul.f32 %v1603_v61, %v1603_v61  ;;  %v751_v21 = vsel %vm315_vm2, %v1603_v61, 0.0 }
 0x1f4   :  { %v765_v2 = vmul.f32 %v1597_v58, %v1597_v58  ;;  %v749_v6 = vsel %vm315_vm2, %v1597_v58, 0.0  ;;  %v894_v0 = vpop.permute.xlu0 %893 }
 0x1f5   :  { %v771_v3 = vadd.f32 %v770_v1, %v769_v30  ;;  %v748_v34 = vadd.f32 %v747_v63, %v746_v62  ;;  %v776_v16 = vsel %vm315_vm2, %v766_v5, 0.0 }
 0x1f6   :  { %v774_v11 = vsel %vm315_vm2, %v765_v2, 0.0  ;;  %v889_v53 = vpop.permute.xlu1 %888 }
 0x1f7   :  { %v750_v8 = vadd.f32 %v749_v6, %v748_v34  ;;  %v773_v10 = vadd.f32 %v772_v4, %v771_v3 }
 0x1f8   :  { %v861_v54 = vpop.permute.xlu0 %860 }
 0x1f9   :  { %v752_v13 = vadd.f32 %v751_v21, %v750_v8  ;;  %v775_v14 = vadd.f32 %v774_v11, %v773_v10 }
 0x1fa   :  { %v830_v31 = vpop.permute.xlu1 %829 }
 0x1fb   :  { %v753_v24 = vrot.slane %v752_v13, 4  ;;  %v777_v7 = vadd.f32 %v776_v16, %v775_v14 }
 0x1fc   :  { %v866_v5 = vpop.permute.xlu0 %865 }
 0x1fd   :  { %v754_v18 = vadd.f32 %v753_v24, %v752_v13  ;;  %v778_v19 = vrot.slane %v777_v7, 4 }
 0x1fe   :  { %v899_v63 = vpop.permute.xlu1 %898 }
 0x1ff   :  { %v755_v23 = vrot.slane %v754_v18, 2  ;;  %v779_v25 = vadd.f32 %v778_v19, %v777_v7 }
 0x201   :  { %v756_v27 = vadd.f32 %v755_v23, %v754_v18  ;;  %v780_v28 = vrot.slane %v779_v25, 2 }
 0x202   :  { %v904_v16 = vpop.permute.xlu1 %903 }
 0x203   :  { %v757_v32 = vrot.slane %v756_v27, 1  ;;  %v781_v33 = vadd.f32 %v780_v28, %v779_v25  ;;  %v909_v25 = vpop.permute.xlu0 %908 }
 0x205   :  { %v758_v37 = vadd.f32 %v757_v32, %v756_v27  ;;  %v782_v38 = vrot.slane %v781_v33, 1 }
 0x206   :  { %v914_v32 = vpop.permute.xlu1 %913 }
 0x207   :  { %v760_v39 = vmul.f32 0.020833334, %v758_v37  ;;  %v783_v35 = vadd.f32 %v782_v38, %v781_v33 }
 0x209   :  { %v784_v9 = vmul.f32 0.020833334, %v783_v35  ;;  %v785_v40 = vmul.f32 %v760_v39, %v760_v39  ;;  %v788_v20 = vsub.f32 %v1583_v50, %v760_v39  ;;  %v789_v51 = vsub.f32 %v1577_v44, %v760_v39 }
 0x20a   :  { %v790_v42 = vsub.f32 %v1585_v52, %v760_v39  ;;  %v791_v45 = vsub.f32 %v1579_v47, %v760_v39  ;;  %v792_v56 = vsub.f32 %v1597_v58, %v760_v39  ;;  %v793_v49 = vsub.f32 %v1603_v61, %v760_v39 }
 0x20b   :  { %v786_v41 = vsub.f32 %v784_v9, %v785_v40  ;;  %v945_v9 = vlaneseq }
 0x20d   :  { %v787_v43 = vmax.f32 %v786_v41, 0.0  ;;  %v946_v41 = vshrl.u32 %v945_v9, 7 }
 0x20f   :  { %v794_v46 = vadd.f32 1e-05, %v787_v43 }
 0x211   :  { %1104 = vrsqrt.f32 %v794_v46  ;;  %v947_v46 = vsub.s32 0, %v946_v41 }
 0x21e   :  { %v1105_v55 = vpop.eup %1104 }
 0x21f   :  { %v796_v59 = vmul.f32 %v1105_v55, %v788_v20  ;;  %v797_v60 = vmul.f32 %v1105_v55, %v789_v51  ;;  %v798_v30 = vmul.f32 %v1105_v55, %v790_v42  ;;  %v799_v62 = vmul.f32 %v1105_v55, %v791_v45 }
 0x220   :  { %v800_v1 = vmul.f32 %v1105_v55, %v792_v56  ;;  %v801_v2 = vmul.f32 %v1105_v55, %v793_v49 }
 0x221   :  { %v832_v3 = vmul.f32 %v805_v12, %v796_v59  ;;  %v833_v50 = vmul.f32 %v810_v17, %v797_v60  ;;  %v834_v34 = vmul.f32 %v815_v22, %v798_v30  ;;  %v835_v44 = vmul.f32 %v820_v26, %v799_v62 }
 0x222   :  { %v836_v4 = vmul.f32 %v825_v57, %v800_v1  ;;  %v837_v52 = vmul.f32 %v830_v31, %v801_v2 }
 0x223   :  { %v868_v47 = vadd.f32 %v841_v29, %v832_v3  ;;  %v869_v6 = vadd.f32 %v846_v36, %v833_v50  ;;  %v870_v8 = vadd.f32 %v851_v15, %v834_v34  ;;  %v871_v58 = vadd.f32 %v856_v48, %v835_v44 }
 0x224   :  { %v872_v10 = vadd.f32 %v861_v54, %v836_v4  ;;  %v873_v61 = vadd.f32 %v866_v5, %v837_v52 }
 0x225   :  { %v874_v21 = vmax.f32 %v868_v47, 0.0  ;;  %v875_v11 = vmax.f32 %v869_v6, 0.0  ;;  %v876_v13 = vmax.f32 %v870_v8, 0.0  ;;  %v877_v14 = vmax.f32 %v871_v58, 0.0 }
 0x226   :  { %v878_v24 = vmax.f32 %v872_v10, 0.0  ;;  %v879_v18 = vmax.f32 %v873_v61, 0.0 }
 0x227   :  { %v916_v7 = vmul.f32 %v889_v53, %v874_v21  ;;  %v917_v12 = vmul.f32 %v894_v0, %v875_v11  ;;  %v918_v17 = vmul.f32 %v899_v63, %v876_v13  ;;  %v919_v19 = vmul.f32 %v904_v16, %v877_v14  ;;  %v943_v53 = vpop.permute.xlu0 %942 }
 0x228   :  { %v920_v28 = vmul.f32 %v909_v25, %v878_v24  ;;  %v921_v36 = vmul.f32 %v914_v32, %v879_v18  ;;  %v948_v31 = vrot.slane %v943_v53, %v947_v46 }
 0x229   :  { %v922_v22 = vsel %vm315_vm2, %v916_v7, 0.0  ;;  %v923_v23 = vsel %vm315_vm2, %v917_v12, 0.0  ;;  %v925_v29 = vsel %vm315_vm2, %v918_v17, 0.0  ;;  %v927_v37 = vsel %vm315_vm2, %v919_v19, 0.0 }
 0x22a   :  { %v924_v27 = vadd.f32 %v923_v23, %v922_v22  ;;  %v929_v39 = vsel %vm315_vm2, %v920_v28, 0.0  ;;  %v931_v26 = vsel %vm315_vm2, %v921_v36, 0.0 }
 0x22c   :  { %v926_v33 = vadd.f32 %v925_v29, %v924_v27 }
 0x22e   :  { %v928_v38 = vadd.f32 %v927_v37, %v926_v33 }
 0x230   :  { %v930_v35 = vadd.f32 %v929_v39, %v928_v38 }
 0x232   :  { %v932_v40 = vadd.f32 %v931_v26, %v930_v35 }
 0x234   :  { %v933_v15 = vrot.slane %v932_v40, 4 }
 0x236   :  { %v934_v43 = vadd.f32 %v933_v15, %v932_v40 }
 0x238   :  { %v935_v57 = vrot.slane %v934_v43, 2 }
 0x23a   :  { %v936_v48 = vadd.f32 %v935_v57, %v934_v43 }
 0x23c   :  { %v937_v0 = vrot.slane %v936_v48, 1 }
 0x23e   :  { %v938_v54 = vadd.f32 %v937_v0, %v936_v48 }
 0x240   :  { %v949_v20 = vadd.f32 %v948_v31, %v938_v54 }
 0x242   :  { %v950_v51 = vsub.f32 0.0, %v949_v20 }
 0x244   :  { %v951_v42 = vmul.f32 1.442695, %v950_v51 }
 0x246   :  { %1106 = vpow2.f32 %v951_v42 }
 0x253   :  { %v1107_v45 = vpop.eup %1106 }
 0x254   :  { %v953_v55 = vadd.f32 1.0, %v1107_v45 }
 0x256   :  { %1108 = vrcp.f32 %v953_v55 }
 0x263   :  { %v1109_v56 = vpop.eup %1108 }
 0x264   :  { %956 = vst.msk [vmem:[#allocation3] sm:$0x1] %vm955_vm3, %v1109_v56 }
 0x265   :  { %1121 = shalt.err (!%p1118_p4)
}
 0x266   :  { %966 = dma.vmem_to_hbm [thread:$0]  %s964_s30, 16, %s1645_s11, [#allocation4]  }
 0x267   :  { %1130 = dma.done.wait [#allocation4], 16  }
 0x268   :  { %1131 = vsyncadd [#allocation4], 4294967280 }
 0x269   :  { %970 = vsyncpa [#allocation4], 1 }

</bundles_post_ra>
